<compile_context>
chip_gen: v5e
topology: v5e:2x2
jax: 0.10.0
libtpu: 0.0.40
codegen_flags: <defaults>
</compile_context>

<pallas_src>
import functools

import numpy as np
import jax
import jax.numpy as jnp
from jax.experimental import pallas as pl
from jax.experimental.pallas import tpu as pltpu


def _round_up(v, m):
    return -(-v // m) * m


_IDX0_2D = lambda b: (0, 0)
_IDX0_3D = lambda b: (0, 0, 0)


# ---------------------------------------------------------------------------
# Pallas kernel: the whole TCN stack for one batch tile
# ---------------------------------------------------------------------------
def _tcn_fused_kernel(mask_ref, x_ref, *refs, layer_meta, kernel_size):
    """mask_ref: (1, W) f32 — 1.0 on valid lanes, 0.0 on per-sequence pad lanes.
    x_ref:    (C_in0_p, W) f32 — TB sequences folded into lanes, pad lanes == 0.
    refs:     per-layer weights (w1, b1, w2, b2[, wd, bd]) ..., out_ref last.
      w1: (K, C_out_p, C_in_p)   per-tap conv1 weight (MXU dtype)
      w2: (K, C_out_p, C_out_p)  per-tap conv2 weight (MXU dtype)
      wd: (C_out_p, C_in_p)      1x1 downsample (only when channels differ)
      biases are (C_out_p, 1) f32.
    """
    out_ref = refs[-1]
    w_refs = refs[:-1]
    K = kernel_size
    mask = mask_ref[...]                          # (1, W)

    def causal_conv(a_f32, w_ref, b_ref, dilation):
        # K accumulating per-tap matmuls on lane-rolled copies.  Because every
        # sequence's first P lanes of `a` are exactly zero and shift <= P, the
        # rolled-in lanes of VALID output columns are the correct causal zeros;
        # only pad columns pick up garbage and those are re-masked by callers.
        a_mx = a_f32.astype(w_ref.dtype)          # MXU-operand cast (f32 or bf16)
        acc = None
        for k in range(K):
            shift = (K - 1 - k) * dilation        # <= P by construction
            a_k = a_mx if shift == 0 else pltpu.roll(a_mx, shift=shift, axis=1)
            t = jnp.dot(w_ref[k], a_k, preferred_element_type=jnp.float32)
            acc = t if acc is None else acc + t
        return acc + b_ref[...]

    a = x_ref[...].astype(jnp.float32)            # current activation (C_p, W)
    n_layers = len(layer_meta)
    r = 0
    for li, (dilation, has_ds) in enumerate(layer_meta):
        w1, b1, w2, b2 = w_refs[r], w_refs[r + 1], w_refs[r + 2], w_refs[r + 3]
        r += 4
        if has_ds:
            wd, bd = w_refs[r], w_refs[r + 1]
            r += 2

        # conv1 -> chomp -> relu (dropout == identity); mask keeps pad lanes
        # exactly zero so conv2's taps read true causal zeros.
        h1 = jnp.maximum(causal_conv(a, w1, b1, dilation), 0.0) * mask
        # conv2 -> chomp -> relu
        h2 = jnp.maximum(causal_conv(h1, w2, b2, dilation), 0.0)
        # residual branch: 1x1 conv iff channel counts differ, else identity
        if has_ds:
            res = jnp.dot(wd[...], a.astype(wd.dtype),
                          preferred_element_type=jnp.float32) + bd[...]
        else:
            res = a
        a = jnp.maximum(h2 + res, 0.0)
        if li != n_layers - 1:
            a = a * mask                          # re-zero pad lanes for next layer
        # (final layer: wrapper slices pad lanes off — mask is redundant there)

    out_ref[...] = a.astype(out_ref.dtype)


# ---------------------------------------------------------------------------
# Wrapper: layout plumbing + batch-parallel pallas_call
# ---------------------------------------------------------------------------
def temporal_conv_net_forward(x, layer_params, *, kernel_size,
                              mxu_dtype=jnp.float32, batch_tile=None):
    """Fused TCN forward.  x: (B, C_in, L) f32 -> (B, C_out_last, L) f32."""
    B, C_in, L = x.shape
    K = kernel_size
    num_levels = len(layer_params)
    P = (K - 1) * (2 ** (num_levels - 1))          # max causal pad over all layers
    Lp = _round_up(L + P, 128)                     # lane-aligned per-sequence width
    pad_right = Lp - (L + P)

    cpad = 16 if mxu_dtype == jnp.bfloat16 else 8  # sublane tile (bf16 packs x2)
    rup = lambda c: _round_up(c, cpad)

    # ---- fold batch into lanes with a per-sequence causal left pad ----------
    ci0_p = rup(C_in)
    x_f = jnp.pad(x.astype(jnp.float32),
                  ((0, 0), (0, ci0_p - C_in), (P, pad_right)))
    x_f = jnp.transpose(x_f, (1, 0, 2)).reshape(ci0_p, B * Lp)   # (C_in0_p, B*Lp)

    # ---- per-tap weights, channel pad, MXU-operand cast ---------------------
    w_args, layer_meta = [], []
    in_ch = C_in
    c_max_p = ci0_p
    for i, p in enumerate(layer_params):
        out_ch = p["w1"].shape[1]
        ci_p, co_p = rup(in_ch), rup(out_ch)
        c_max_p = max(c_max_p, co_p)
        dilation = 2 ** i
        has_ds = "wd" in p
        layer_meta.append((dilation, has_ds))

        w1 = jnp.pad(p["w1"], ((0, 0), (0, co_p - out_ch), (0, ci_p - in_ch)))
        w_args.append(w1.astype(mxu_dtype))                      # (K, co_p, ci_p)
        w_args.append(jnp.pad(p["b1"], (0, co_p - out_ch))
                      .reshape(co_p, 1).astype(jnp.float32))
        w2 = jnp.pad(p["w2"], ((0, 0), (0, co_p - out_ch), (0, co_p - out_ch)))
        w_args.append(w2.astype(mxu_dtype))                      # (K, co_p, co_p)
        w_args.append(jnp.pad(p["b2"], (0, co_p - out_ch))
                      .reshape(co_p, 1).astype(jnp.float32))
        if has_ds:
            wd = jnp.pad(p["wd"], ((0, co_p - out_ch), (0, ci_p - in_ch)))
            w_args.append(wd.astype(mxu_dtype))                  # (co_p, ci_p)
            w_args.append(jnp.pad(p["bd"], (0, co_p - out_ch))
                          .reshape(co_p, 1).astype(jnp.float32))
        in_ch = out_ch
    c_last, c_last_p = in_ch, rup(in_ch)

    # ---- batch tile sized for VMEM (conservative for v7x's 64 MiB/TC) -------
    weight_bytes = sum(int(np.prod(w.shape)) * w.dtype.itemsize for w in w_args)
    if batch_tile is None:
        budget = 40 << 20
        bytes_per_seq = Lp * 4 * (2 * ci0_p + 2 * c_last_p + 6 * c_max_p)
        batch_tile = int(max(1, min(B, (budget - weight_bytes) // max(1, bytes_per_seq))))
        while B % batch_tile:                      # largest divisor of B under budget
            batch_tile -= 1
    TB = int(batch_tile)
    assert B % TB == 0, (B, TB)
    W_tile = TB * Lp

    # valid-lane mask (identical for every batch tile): 1 on the L real lanes,
    # 0 on each sequence's P leading-pad and pad_right trailing-pad lanes.
    mask_np = np.zeros((1, W_tile), np.float32)
    for b in range(TB):
        mask_np[0, b * Lp + P: b * Lp + P + L] = 1.0
    mask = jnp.asarray(mask_np)

    # ---- specs ---------------------------------------------------------------
    in_specs = [
        pl.BlockSpec((1, W_tile), _IDX0_2D),               # mask (tile-invariant)
        pl.BlockSpec((ci0_p, W_tile), lambda b: (0, b)),    # folded activations
        # NOTE: raise pipelining with pipeline_mode=pl.Buffered(3) here if xprof
        # shows exposed input DMA per grid step at small per-tile compute.
    ]
    for w in w_args:  # weights/biases: constant index_map -> DMA'd once, resident
        in_specs.append(pl.BlockSpec(w.shape, _IDX0_3D if w.ndim == 3 else _IDX0_2D))
    out_specs = pl.BlockSpec((c_last_p, W_tile), lambda b: (0, b))

    vmem_limit = (weight_bytes
                  + 4 * W_tile * 4 * (ci0_p + c_last_p)     # double-buffered in/out
                  + 8 * W_tile * 4 * c_max_p                # live activation temps
                  + (2 << 20))
    vmem_limit = int(min(max(vmem_limit, 32 << 20), 64 << 20))

    kernel = functools.partial(_tcn_fused_kernel,
                               layer_meta=tuple(layer_meta), kernel_size=K)

    out = pl.pallas_call(
        kernel,
        out_shape=jax.ShapeDtypeStruct((c_last_p, B * Lp), jnp.float32),
        grid_spec=pltpu.PrefetchScalarGridSpec(
            num_scalar_prefetch=0,
            grid=(B // TB,),
            in_specs=in_specs,
            out_specs=out_specs,
        ),
        compiler_params=pltpu.CompilerParams(
            dimension_semantics=("parallel",),
            vmem_limit_bytes=vmem_limit,
        ),
    )(mask, x_f, *w_args)

    # ---- unfold batch back out of the lane axis (layout plumbing only) ------
    out = out.reshape(c_last_p, B, Lp)[:c_last, :, P:P + L]     # (C_out, B, L)
    return jnp.transpose(out, (1, 0, 2))                        # (B, C_out, L)


# ---------------------------------------------------------------------------
# Deterministic parameter init (shapes follow TemporalBlock.__init__)
# ---------------------------------------------------------------------------
def init_tcn_params(key, num_inputs, num_channels, kernel_size):
    layer_params = []
    in_ch = num_inputs
    for out_ch in num_channels:
        key, k1, k2, k3, k4, k5, k6 = jax.random.split(key, 7)
        p = {
            # conv weights stored as (K, C_out, C_in) — tap-major, i.e. PyTorch
            # Conv1d weight (C_out, C_in, K) permuted to (K, C_out, C_in)
            "w1": 0.01 * jax.random.normal(k1, (kernel_size, out_ch, in_ch), jnp.float32),
            "b1": 0.01 * jax.random.normal(k2, (out_ch,), jnp.float32),
            "w2": 0.01 * jax.random.normal(k3, (kernel_size, out_ch, out_ch), jnp.float32),
            "b2": 0.01 * jax.random.normal(k4, (out_ch,), jnp.float32),
        }
        if in_ch != out_ch:  # downsample 1x1 conv only when channels differ
            p["wd"] = 0.01 * jax.random.normal(k5, (out_ch, in_ch), jnp.float32)
            p["bd"] = 0.01 * jax.random.normal(k6, (out_ch,), jnp.float32)
        layer_params.append(p)
        in_ch = out_ch
    return layer_params


# ---------------------------------------------------------------------------
# Pure-JAX reference (correctness check of the Pallas lowering)
# ---------------------------------------------------------------------------
def _ref_causal_conv(x, w, b, dilation):
    K = w.shape[0]
    B, C_in, L = x.shape
    C_out = w.shape[1]
    acc = jnp.zeros((B, C_out, L), jnp.float32)
    for k in range(K):
        s = (K - 1 - k) * dilation
        xs = jnp.pad(x, ((0, 0), (0, 0), (s, 0)))[:, :, :L]
        acc = acc + jnp.einsum("oi,bil->bol", w[k], xs)
    return acc + b[None, :, None]


def _ref_block(x, p, dilation):
    h1 = jax.nn.relu(_ref_causal_conv(x, p["w1"], p["b1"], dilation))
    h2 = jax.nn.relu(_ref_causal_conv(h1, p["w2"], p["b2"], dilation))
    if "wd" in p:
        res = jnp.einsum("oi,bil->bol", p["wd"], x) + p["bd"][None, :, None]
    else:
        res = x
    return jax.nn.relu(h2 + res)


def _ref_tcn(x, layer_params):
    out = x
    for i, p in enumerate(layer_params):
        out = _ref_block(out, p, 2 ** i)
    return out


# ---------------------------------------------------------------------------
if __name__ == "__main__":
    key = jax.random.PRNGKey(0)
    kx, kp = jax.random.split(key)

    # TemporalConvNet(num_inputs=4, num_channels=[8, 8], kernel_size=2, dropout=0.1)
    num_inputs = 4
    num_channels = [8, 8]     # layer 0: 4->8 (downsample), layer 1: 8->8 (identity res)
    kernel_size = 2
    batch, seq_len = 4, 16

    x = jax.random.normal(kx, (batch, num_inputs, seq_len), jnp.float32)
    layer_params = init_tcn_params(kp, num_inputs, num_channels, kernel_size)

    # mxu_dtype=jnp.bfloat16 is the v6e/v7x setting at realistic channel widths
    # (loosen the allclose tolerance accordingly); f32 keeps the 1e-5 check tight
    # at these toy sizes.  batch_tile=2 -> grid=(2,) "parallel" over batch tiles.
    fwd = jax.jit(functools.partial(temporal_conv_net_forward,
                                    kernel_size=kernel_size,
                                    mxu_dtype=jnp.float32,
                                    batch_tile=2))
    y = jax.block_until_ready(fwd(x, layer_params))

    y_ref = jax.block_until_ready(_ref_tcn(x, layer_params))
    assert y.shape == (batch, num_channels[-1], seq_len), y.shape
    assert jnp.allclose(y, y_ref, atol=1e-5, rtol=1e-5), "mismatch vs JAX reference"

    print("KERNEL_OK")
</pallas_src>

<mosaic_0001>
module attributes {stable_mosaic.version = 11 : i64} {
  func.func @_tcn_fused_kernel(%arg0: i32, %arg1: memref<1x256xf32, #tpu.memory_space<vmem>>, %arg2: memref<8x256xf32, #tpu.memory_space<vmem>>, %arg3: memref<2x8x8xf32, #tpu.memory_space<vmem>>, %arg4: memref<8x1xf32, #tpu.memory_space<vmem>>, %arg5: memref<2x8x8xf32, #tpu.memory_space<vmem>>, %arg6: memref<8x1xf32, #tpu.memory_space<vmem>>, %arg7: memref<8x8xf32, #tpu.memory_space<vmem>>, %arg8: memref<8x1xf32, #tpu.memory_space<vmem>>, %arg9: memref<2x8x8xf32, #tpu.memory_space<vmem>>, %arg10: memref<8x1xf32, #tpu.memory_space<vmem>>, %arg11: memref<2x8x8xf32, #tpu.memory_space<vmem>>, %arg12: memref<8x1xf32, #tpu.memory_space<vmem>>, %arg13: memref<8x256xf32, #tpu.memory_space<vmem>>) attributes {dimension_semantics = [#tpu.dimension_semantics<parallel>], iteration_bounds = array<i64: 2>, scalar_prefetch = 0 : i64, scratch_operands = 0 : i64, tpu.core_type = #tpu.core_type<tc>, window_params = [{pipeline_mode = #tpu.pipeline_mode<synchronous>, transform_indices = @transform_0, window_bounds = array<i64: 1, 256>}, {transform_indices = @transform_1, window_bounds = array<i64: 8, 256>}, {pipeline_mode = #tpu.pipeline_mode<synchronous>, transform_indices = @transform_2, window_bounds = array<i64: 2, 8, 8>}, {pipeline_mode = #tpu.pipeline_mode<synchronous>, transform_indices = @transform_3, window_bounds = array<i64: 8, 1>}, {pipeline_mode = #tpu.pipeline_mode<synchronous>, transform_indices = @transform_4, window_bounds = array<i64: 2, 8, 8>}, {pipeline_mode = #tpu.pipeline_mode<synchronous>, transform_indices = @transform_5, window_bounds = array<i64: 8, 1>}, {pipeline_mode = #tpu.pipeline_mode<synchronous>, transform_indices = @transform_6, window_bounds = array<i64: 8, 8>}, {pipeline_mode = #tpu.pipeline_mode<synchronous>, transform_indices = @transform_7, window_bounds = array<i64: 8, 1>}, {pipeline_mode = #tpu.pipeline_mode<synchronous>, transform_indices = @transform_8, window_bounds = array<i64: 2, 8, 8>}, {pipeline_mode = #tpu.pipeline_mode<synchronous>, transform_indices = @transform_9, window_bounds = array<i64: 8, 1>}, {pipeline_mode = #tpu.pipeline_mode<synchronous>, transform_indices = @transform_10, window_bounds = array<i64: 2, 8, 8>}, {pipeline_mode = #tpu.pipeline_mode<synchronous>, transform_indices = @transform_11, window_bounds = array<i64: 8, 1>}, {transform_indices = @transform_12, window_bounds = array<i64: 8, 256>}]} {
    %c0 = arith.constant 0 : index
    %c0_0 = arith.constant 0 : index
    %0 = vector.load %arg1[%c0, %c0_0] : memref<1x256xf32, #tpu.memory_space<vmem>>, vector<1x256xf32>
    %c0_1 = arith.constant 0 : index
    %c0_2 = arith.constant 0 : index
    %1 = vector.load %arg2[%c0_1, %c0_2] : memref<8x256xf32, #tpu.memory_space<vmem>>, vector<8x256xf32>
    %c1_i32 = arith.constant 1 : i32
    %2 = tpu.dynamic_rotate %1 by %c1_i32 dim 1 : vector<8x256xf32>, i32 -> vector<8x256xf32>
    %c0_3 = arith.constant 0 : index
    %c0_4 = arith.constant 0 : index
    %c0_5 = arith.constant 0 : index
    %3 = vector.load %arg3[%c0_3, %c0_4, %c0_5] : memref<2x8x8xf32, #tpu.memory_space<vmem>>, vector<1x8x8xf32>
    %4 = vector.shape_cast %3 : vector<1x8x8xf32> to vector<8x8xf32>
    %cst = arith.constant dense<0.000000e+00> : vector<8x256xf32>
    %5 = tpu.matmul %4, %2, %cst {dimension_numbers = #tpu.dot_dimension_numbers<[1], [0], [0], [1], [0, 0, 1, 1], [], []>} : vector<8x8xf32>, vector<8x256xf32>, vector<8x256xf32> -> vector<8x256xf32>
    %c1 = arith.constant 1 : index
    %c0_6 = arith.constant 0 : index
    %c0_7 = arith.constant 0 : index
    %6 = vector.load %arg3[%c1, %c0_6, %c0_7] : memref<2x8x8xf32, #tpu.memory_space<vmem>>, vector<1x8x8xf32>
    %7 = vector.shape_cast %6 : vector<1x8x8xf32> to vector<8x8xf32>
    %cst_8 = arith.constant dense<0.000000e+00> : vector<8x256xf32>
    %8 = tpu.matmul %7, %1, %cst_8 {dimension_numbers = #tpu.dot_dimension_numbers<[1], [0], [0], [1], [0, 0, 1, 1], [], []>} : vector<8x8xf32>, vector<8x256xf32>, vector<8x256xf32> -> vector<8x256xf32>
    %9 = arith.addf %5, %8 : vector<8x256xf32>
    %c0_9 = arith.constant 0 : index
    %c0_10 = arith.constant 0 : index
    %10 = vector.load %arg4[%c0_9, %c0_10] : memref<8x1xf32, #tpu.memory_space<vmem>>, vector<8x1xf32>
    %11 = vector.broadcast %10 : vector<8x1xf32> to vector<8x256xf32>
    %12 = arith.addf %9, %11 : vector<8x256xf32>
    %cst_11 = arith.constant 0.000000e+00 : f32
    %13 = vector.broadcast %cst_11 : f32 to vector<8x256xf32>
    %14 = arith.maximumf %12, %13 : vector<8x256xf32>
    %15 = vector.broadcast %0 : vector<1x256xf32> to vector<8x256xf32>
    %16 = arith.mulf %14, %15 : vector<8x256xf32>
    %c1_i32_12 = arith.constant 1 : i32
    %17 = tpu.dynamic_rotate %16 by %c1_i32_12 dim 1 : vector<8x256xf32>, i32 -> vector<8x256xf32>
    %c0_13 = arith.constant 0 : index
    %c0_14 = arith.constant 0 : index
    %c0_15 = arith.constant 0 : index
    %18 = vector.load %arg5[%c0_13, %c0_14, %c0_15] : memref<2x8x8xf32, #tpu.memory_space<vmem>>, vector<1x8x8xf32>
    %19 = vector.shape_cast %18 : vector<1x8x8xf32> to vector<8x8xf32>
    %cst_16 = arith.constant dense<0.000000e+00> : vector<8x256xf32>
    %20 = tpu.matmul %19, %17, %cst_16 {dimension_numbers = #tpu.dot_dimension_numbers<[1], [0], [0], [1], [0, 0, 1, 1], [], []>} : vector<8x8xf32>, vector<8x256xf32>, vector<8x256xf32> -> vector<8x256xf32>
    %c1_17 = arith.constant 1 : index
    %c0_18 = arith.constant 0 : index
    %c0_19 = arith.constant 0 : index
    %21 = vector.load %arg5[%c1_17, %c0_18, %c0_19] : memref<2x8x8xf32, #tpu.memory_space<vmem>>, vector<1x8x8xf32>
    %22 = vector.shape_cast %21 : vector<1x8x8xf32> to vector<8x8xf32>
    %cst_20 = arith.constant dense<0.000000e+00> : vector<8x256xf32>
    %23 = tpu.matmul %22, %16, %cst_20 {dimension_numbers = #tpu.dot_dimension_numbers<[1], [0], [0], [1], [0, 0, 1, 1], [], []>} : vector<8x8xf32>, vector<8x256xf32>, vector<8x256xf32> -> vector<8x256xf32>
    %24 = arith.addf %20, %23 : vector<8x256xf32>
    %c0_21 = arith.constant 0 : index
    %c0_22 = arith.constant 0 : index
    %25 = vector.load %arg6[%c0_21, %c0_22] : memref<8x1xf32, #tpu.memory_space<vmem>>, vector<8x1xf32>
    %26 = vector.broadcast %25 : vector<8x1xf32> to vector<8x256xf32>
    %27 = arith.addf %24, %26 : vector<8x256xf32>
    %cst_23 = arith.constant 0.000000e+00 : f32
    %28 = vector.broadcast %cst_23 : f32 to vector<8x256xf32>
    %29 = arith.maximumf %27, %28 : vector<8x256xf32>
    %c0_24 = arith.constant 0 : index
    %c0_25 = arith.constant 0 : index
    %30 = vector.load %arg7[%c0_24, %c0_25] : memref<8x8xf32, #tpu.memory_space<vmem>>, vector<8x8xf32>
    %cst_26 = arith.constant dense<0.000000e+00> : vector<8x256xf32>
    %31 = tpu.matmul %30, %1, %cst_26 {dimension_numbers = #tpu.dot_dimension_numbers<[1], [0], [0], [1], [0, 0, 1, 1], [], []>} : vector<8x8xf32>, vector<8x256xf32>, vector<8x256xf32> -> vector<8x256xf32>
    %c0_27 = arith.constant 0 : index
    %c0_28 = arith.constant 0 : index
    %32 = vector.load %arg8[%c0_27, %c0_28] : memref<8x1xf32, #tpu.memory_space<vmem>>, vector<8x1xf32>
    %33 = vector.broadcast %32 : vector<8x1xf32> to vector<8x256xf32>
    %34 = arith.addf %31, %33 : vector<8x256xf32>
    %35 = arith.addf %29, %34 : vector<8x256xf32>
    %cst_29 = arith.constant 0.000000e+00 : f32
    %36 = vector.broadcast %cst_29 : f32 to vector<8x256xf32>
    %37 = arith.maximumf %35, %36 : vector<8x256xf32>
    %38 = vector.broadcast %0 : vector<1x256xf32> to vector<8x256xf32>
    %39 = arith.mulf %37, %38 : vector<8x256xf32>
    %c2_i32 = arith.constant 2 : i32
    %40 = tpu.dynamic_rotate %39 by %c2_i32 dim 1 : vector<8x256xf32>, i32 -> vector<8x256xf32>
    %c0_30 = arith.constant 0 : index
    %c0_31 = arith.constant 0 : index
    %c0_32 = arith.constant 0 : index
    %41 = vector.load %arg9[%c0_30, %c0_31, %c0_32] : memref<2x8x8xf32, #tpu.memory_space<vmem>>, vector<1x8x8xf32>
    %42 = vector.shape_cast %41 : vector<1x8x8xf32> to vector<8x8xf32>
    %cst_33 = arith.constant dense<0.000000e+00> : vector<8x256xf32>
    %43 = tpu.matmul %42, %40, %cst_33 {dimension_numbers = #tpu.dot_dimension_numbers<[1], [0], [0], [1], [0, 0, 1, 1], [], []>} : vector<8x8xf32>, vector<8x256xf32>, vector<8x256xf32> -> vector<8x256xf32>
    %c1_34 = arith.constant 1 : index
    %c0_35 = arith.constant 0 : index
    %c0_36 = arith.constant 0 : index
    %44 = vector.load %arg9[%c1_34, %c0_35, %c0_36] : memref<2x8x8xf32, #tpu.memory_space<vmem>>, vector<1x8x8xf32>
    %45 = vector.shape_cast %44 : vector<1x8x8xf32> to vector<8x8xf32>
    %cst_37 = arith.constant dense<0.000000e+00> : vector<8x256xf32>
    %46 = tpu.matmul %45, %39, %cst_37 {dimension_numbers = #tpu.dot_dimension_numbers<[1], [0], [0], [1], [0, 0, 1, 1], [], []>} : vector<8x8xf32>, vector<8x256xf32>, vector<8x256xf32> -> vector<8x256xf32>
    %47 = arith.addf %43, %46 : vector<8x256xf32>
    %c0_38 = arith.constant 0 : index
    %c0_39 = arith.constant 0 : index
    %48 = vector.load %arg10[%c0_38, %c0_39] : memref<8x1xf32, #tpu.memory_space<vmem>>, vector<8x1xf32>
    %49 = vector.broadcast %48 : vector<8x1xf32> to vector<8x256xf32>
    %50 = arith.addf %47, %49 : vector<8x256xf32>
    %cst_40 = arith.constant 0.000000e+00 : f32
    %51 = vector.broadcast %cst_40 : f32 to vector<8x256xf32>
    %52 = arith.maximumf %50, %51 : vector<8x256xf32>
    %53 = vector.broadcast %0 : vector<1x256xf32> to vector<8x256xf32>
    %54 = arith.mulf %52, %53 : vector<8x256xf32>
    %c2_i32_41 = arith.constant 2 : i32
    %55 = tpu.dynamic_rotate %54 by %c2_i32_41 dim 1 : vector<8x256xf32>, i32 -> vector<8x256xf32>
    %c0_42 = arith.constant 0 : index
    %c0_43 = arith.constant 0 : index
    %c0_44 = arith.constant 0 : index
    %56 = vector.load %arg11[%c0_42, %c0_43, %c0_44] : memref<2x8x8xf32, #tpu.memory_space<vmem>>, vector<1x8x8xf32>
    %57 = vector.shape_cast %56 : vector<1x8x8xf32> to vector<8x8xf32>
    %cst_45 = arith.constant dense<0.000000e+00> : vector<8x256xf32>
    %58 = tpu.matmul %57, %55, %cst_45 {dimension_numbers = #tpu.dot_dimension_numbers<[1], [0], [0], [1], [0, 0, 1, 1], [], []>} : vector<8x8xf32>, vector<8x256xf32>, vector<8x256xf32> -> vector<8x256xf32>
    %c1_46 = arith.constant 1 : index
    %c0_47 = arith.constant 0 : index
    %c0_48 = arith.constant 0 : index
    %59 = vector.load %arg11[%c1_46, %c0_47, %c0_48] : memref<2x8x8xf32, #tpu.memory_space<vmem>>, vector<1x8x8xf32>
    %60 = vector.shape_cast %59 : vector<1x8x8xf32> to vector<8x8xf32>
    %cst_49 = arith.constant dense<0.000000e+00> : vector<8x256xf32>
    %61 = tpu.matmul %60, %54, %cst_49 {dimension_numbers = #tpu.dot_dimension_numbers<[1], [0], [0], [1], [0, 0, 1, 1], [], []>} : vector<8x8xf32>, vector<8x256xf32>, vector<8x256xf32> -> vector<8x256xf32>
    %62 = arith.addf %58, %61 : vector<8x256xf32>
    %c0_50 = arith.constant 0 : index
    %c0_51 = arith.constant 0 : index
    %63 = vector.load %arg12[%c0_50, %c0_51] : memref<8x1xf32, #tpu.memory_space<vmem>>, vector<8x1xf32>
    %64 = vector.broadcast %63 : vector<8x1xf32> to vector<8x256xf32>
    %65 = arith.addf %62, %64 : vector<8x256xf32>
    %cst_52 = arith.constant 0.000000e+00 : f32
    %66 = vector.broadcast %cst_52 : f32 to vector<8x256xf32>
    %67 = arith.maximumf %65, %66 : vector<8x256xf32>
    %68 = arith.addf %67, %39 : vector<8x256xf32>
    %cst_53 = arith.constant 0.000000e+00 : f32
    %69 = vector.broadcast %cst_53 : f32 to vector<8x256xf32>
    %70 = arith.maximumf %68, %69 : vector<8x256xf32>
    %c0_54 = arith.constant 0 : index
    %c0_55 = arith.constant 0 : index
    %71 = vector.load %arg13[%c0_54, %c0_55] : memref<8x256xf32, #tpu.memory_space<vmem>>, vector<8x256xf32>
    tpu.vector_store %arg13[%c0_54, %c0_55], %70 {strides = array<i32>} : memref<8x256xf32, #tpu.memory_space<vmem>>, vector<8x256xf32>,
    return
  }
  func.func @transform_0(%arg0: i32) -> (i32, i32) {
    %c0_i32 = arith.constant 0 : i32
    %c0_i32_0 = arith.constant 0 : i32
    %c0_i32_1 = arith.constant 0 : i32
    return %c0_i32, %c0_i32_0 : i32, i32
  }
  func.func @transform_1(%arg0: i32) -> (i32, i32) {
    %c0_i32 = arith.constant 0 : i32
    %c0_i32_0 = arith.constant 0 : i32
    return %c0_i32, %arg0 : i32, i32
  }
  func.func @transform_2(%arg0: i32) -> (i32, i32, i32) {
    %c0_i32 = arith.constant 0 : i32
    %c0_i32_0 = arith.constant 0 : i32
    %c0_i32_1 = arith.constant 0 : i32
    %c0_i32_2 = arith.constant 0 : i32
    return %c0_i32, %c0_i32_0, %c0_i32_1 : i32, i32, i32
  }
  func.func @transform_3(%arg0: i32) -> (i32, i32) {
    %c0_i32 = arith.constant 0 : i32
    %c0_i32_0 = arith.constant 0 : i32
    %c0_i32_1 = arith.constant 0 : i32
    return %c0_i32, %c0_i32_0 : i32, i32
  }
  func.func @transform_4(%arg0: i32) -> (i32, i32, i32) {
    %c0_i32 = arith.constant 0 : i32
    %c0_i32_0 = arith.constant 0 : i32
    %c0_i32_1 = arith.constant 0 : i32
    %c0_i32_2 = arith.constant 0 : i32
    return %c0_i32, %c0_i32_0, %c0_i32_1 : i32, i32, i32
  }
  func.func @transform_5(%arg0: i32) -> (i32, i32) {
    %c0_i32 = arith.constant 0 : i32
    %c0_i32_0 = arith.constant 0 : i32
    %c0_i32_1 = arith.constant 0 : i32
    return %c0_i32, %c0_i32_0 : i32, i32
  }
  func.func @transform_6(%arg0: i32) -> (i32, i32) {
    %c0_i32 = arith.constant 0 : i32
    %c0_i32_0 = arith.constant 0 : i32
    %c0_i32_1 = arith.constant 0 : i32
    return %c0_i32, %c0_i32_0 : i32, i32
  }
  func.func @transform_7(%arg0: i32) -> (i32, i32) {
    %c0_i32 = arith.constant 0 : i32
    %c0_i32_0 = arith.constant 0 : i32
    %c0_i32_1 = arith.constant 0 : i32
    return %c0_i32, %c0_i32_0 : i32, i32
  }
  func.func @transform_8(%arg0: i32) -> (i32, i32, i32) {
    %c0_i32 = arith.constant 0 : i32
    %c0_i32_0 = arith.constant 0 : i32
    %c0_i32_1 = arith.constant 0 : i32
    %c0_i32_2 = arith.constant 0 : i32
    return %c0_i32, %c0_i32_0, %c0_i32_1 : i32, i32, i32
  }
  func.func @transform_9(%arg0: i32) -> (i32, i32) {
    %c0_i32 = arith.constant 0 : i32
    %c0_i32_0 = arith.constant 0 : i32
    %c0_i32_1 = arith.constant 0 : i32
    return %c0_i32, %c0_i32_0 : i32, i32
  }
  func.func @transform_10(%arg0: i32) -> (i32, i32, i32) {
    %c0_i32 = arith.constant 0 : i32
    %c0_i32_0 = arith.constant 0 : i32
    %c0_i32_1 = arith.constant 0 : i32
    %c0_i32_2 = arith.constant 0 : i32
    return %c0_i32, %c0_i32_0, %c0_i32_1 : i32, i32, i32
  }
  func.func @transform_11(%arg0: i32) -> (i32, i32) {
    %c0_i32 = arith.constant 0 : i32
    %c0_i32_0 = arith.constant 0 : i32
    %c0_i32_1 = arith.constant 0 : i32
    return %c0_i32, %c0_i32_0 : i32, i32
  }
  func.func @transform_12(%arg0: i32) -> (i32, i32) {
    %c0_i32 = arith.constant 0 : i32
    %c0_i32_0 = arith.constant 0 : i32
    return %c0_i32, %arg0 : i32, i32
  }
}

</mosaic_0001>

<bundles_post_ra>
// kernel: temporal_conv_net_forward.1
= control target key start
LH: loop header
LB: loop body
LE: loop exit
PB: predicated region body
PF: predicated region fallthrough
CT: control target
= control target key end

     0   :  { %s1115_s21 = smov 0   ;;  %s1236_s0 = inlined_call_operand.vmem [shape: f32[1,256], index: 0, kind: input, shape index: {}]   ;;  %s1237_s1 = inlined_call_operand.vmem [shape: f32[8,512], index: 1, kind: input, shape index: {}]   ;;  %s1238_s2 = inlined_call_operand.vmem [shape: f32[2,8,8], index: 2, kind: input, shape index: {}]   ;;  %s1239_s3 = inlined_call_operand.vmem [shape: f32[8,1], index: 3, kind: input, shape index: {}]   ;;  %s1240_s4 = inlined_call_operand.vmem [shape: f32[2,8,8], index: 4, kind: input, shape index: {}]   ;;  %s1241_s5 = inlined_call_operand.vmem [shape: f32[8,1], index: 5, kind: input, shape index: {}]   ;;  %s1242_s6 = inlined_call_operand.vmem [shape: f32[8,8], index: 6, kind: input, shape index: {}]   ;;  %s1243_s7 = inlined_call_operand.vmem [shape: f32[8,1], index: 7, kind: input, shape index: {}]   ;;  %s1244_s8 = inlined_call_operand.vmem [shape: f32[2,8,8], index: 8, kind: input, shape index: {}]   ;;  %s1245_s9 = inlined_call_operand.vmem [shape: f32[8,1], index: 9, kind: input, shape index: {}]   ;;  %s1246_s10 = inlined_call_operand.vmem [shape: f32[2,8,8], index: 10, kind: input, shape index: {}]   ;;  %s1247_s11 = inlined_call_operand.vmem [shape: f32[8,1], index: 11, kind: input, shape index: {}]   ;;  %s1248_s12 = inlined_call_operand.vmem [shape: f32[8,512], index: 12, kind: output, shape index: {}]  }
   0x1 LB: > { %s972_s22 = sadd.s32 4294967295, %s1045_s21   ;;  %p976_p0 = scmp.ge.s32.totalorder %s1045_s21, 1  ;;  %s1045_s21 = sphi %s1115_s21, %s22_s21  }
   0x2   : > { %p363_p1 = scmp.lt.s32.totalorder %s1045_s21, 3 }
   0x4   : > { %p364_p2 = pnand %p976_p0, %p363_p1 }
   0x5   : > { %s977_s23 = sshll.u32 (!%p364_p2), %s972_s22, 1  ;;  %s1047_s28 = smov (!%p364_p2), 1  }
   0x6   : > { %367 = sbr.rel (%p364_p2) target bundleno = 1008 (0x3f0), region = 68  ;;  %p406_p3 = scmp.lt.s32.totalorder (!%p364_p2), %s977_s23, 3 }
   0x7   : > { %s1049_s20 = smov (!%p364_p2), 2  }
   0xb   : > { %s1250_s23 = smov (!%p406_p3, %s977_s23), 3  ;;  %vm432_vm0 = vcmask 64512   ;;  %v981_v3 = vld [vmem:[%s1238_s2 + $0x8] sm:$0xff]  ;;  %v519_v4 = vld [vmem:[%s1239_s3] sm:$0xff]  ;;  %v1048_v5 = vmov 0   ;;  %v424_v7 = vlaneseq }
   0xc   : > { %s978_s24 = sshll.u32 %s1250_s23, 3  ;;  %1021 = vset.pattern.permute.xlu0 %v1048_v5  ;;  %1027 = vset.pattern.permute.xlu1 %v1048_v5  ;;  %v900_v6 = vld [vmem:[%s1247_s11] sm:$0xff]  ;;  %v986_v32 = vld [vmem:[%s1240_s4 + $0x8] sm:$0xff] }
   0xd   : > { %s409_s27 = scalar_lea.vmem %s1237_s1, %s978_s24  ;;  %1028 = vset.pattern.permute.xlu2 %v1048_v5  ;;  %v1143_v8 = vand.u32 127, %v424_v7  ;;  %v429_v12 = vld [vmem:[%s1238_s2] sm:$0xff]  ;;  %s415_s14 = scalar_lea.vmem %s1248_s12, %s978_s24 }
   0xe   : > { %v418_v0 = vld [vmem:[%s409_s27] sm:$0xff]  ;;  %v419_v1 = vld [vmem:[%s409_s27 + $0x8] sm:$0xff] }
   0xf   : > { %v1016_v2 = vpack.i.bf16 %v419_v1, %v418_v0  ;;  %451 = vmatpush.msra.mxu0 %v418_v0  ;;  %471 = vmatpush.msra.mxu1 %v419_v1  ;;  %vm426_vm1 = vcmp.lt.s32.totalorder %v1143_v8, 1  ;;  %v417_v19 = vld [vmem:[%s1236_s0] sm:$0x3]  ;;  %vm701_vm2 = vcmp.lt.s32.totalorder %v1143_v8, 2 }
  0x10   : > { %982 = vmatmul.msk.f32.vlgmr.msra.gmra.mxu0 %vm432_vm0, %v981_v3  ;;  %983 = vmatmul.msk.f32.vlgmr.msra.gmra.mxu1 %vm432_vm0, %v981_v3  ;;  %v1158_v25 = vperm.slane %v417_v19, 0  ;;  %v1160_v26 = vperm.slane %v417_v19, 1  ;;  %v631_v33 = vld [vmem:[%s1241_s5] sm:$0xff] }
  0x11   : > { %1017 = vrot.lane.b32.xlu0 %v1016_v2, %s1047_s28  ;;  %v642_v34 = vld [vmem:[%s1243_s7] sm:$0xff] }
  0x12   : > { %645 = vperm.xlu2 %1028, %v642_v34   ;;  %v641_v35 = vld [vmem:[%s1242_s6] sm:$0xff] }
  0x13   : > { %v793_v36 = vld [vmem:[%s1245_s9] sm:$0xff] }
  0x14   : > { %v542_v40 = vld [vmem:[%s1240_s4] sm:$0xff] }
  0x19   : > { %522 = vperm.xlu0 %1021, %v519_v4  }
  0x21   : > { %903 = vperm.xlu0 %1021, %v900_v6   ;;  %v704_v6 = vld [vmem:[%s1244_s8] sm:$0xff] }
  0x6c   : > { %v646_v45 = vpop.permute.xlu2 %645 }
  0x83   : > { %v1018_v9 = vpop.permute.xlu0 %1017 }
  0x84   : > { %v1020_v10 = vunpack.i.h.bf16 %v1018_v9  ;;  %v1019_v11 = vunpack.i.l.bf16 %v1018_v9 }
  0x86   : > { %v428_v13 = vsel %vm426_vm1, %v1020_v10, %v1019_v11  ;;  %v427_v14 = vsel %vm426_vm1, %v1019_v11, %v1020_v10 }
  0x87   : > { %494 = vmatpush.msra.mxu2 %v428_v13  ;;  %514 = vmatpush.msra.mxu3 %v427_v14 }
  0x88   : > { %984 = vmatmul.msk.f32.vlgmr.msra.gmra.mxu2 %vm432_vm0, %v429_v12  ;;  %985 = vmatmul.msk.f32.vlgmr.msra.gmra.mxu3 %vm432_vm0, %v429_v12 }
  0x8b   : > { %v523_v22 = vpop.permute.xlu0 %522 }
  0x8d   : > { %v453_v15 = vpop.f32.mrf.mxu0  ;;  %v473_v16 = vpop.f32.mrf.mxu1 }
 0x10b   : > { %v496_v17 = vpop.f32.mrf.mxu2  ;;  %v516_v18 = vpop.f32.mrf.mxu3 }
 0x10c   : > { %v497_v20 = vadd.f32 %v496_v17, %v453_v15  ;;  %v517_v21 = vadd.f32 %v516_v18, %v473_v16 }
 0x10e   : > { %v525_v23 = vadd.f32 %v523_v22, %v497_v20  ;;  %v526_v24 = vadd.f32 %v523_v22, %v517_v21 }
 0x110   : > { %v527_v27 = vmax.f32 %v525_v23, 0.0  ;;  %v528_v28 = vmax.f32 %v526_v24, 0.0  ;;  %v998_v23 = vld [vmem:[%s1246_s10 + $0x8] sm:$0xff] }
 0x112   : > { %v534_v29 = vmul.f32 %v1158_v25, %v527_v27  ;;  %v535_v30 = vmul.f32 %v1160_v26, %v528_v28 }
 0x114   : > { %563 = vmatpush.msrb.mxu0 %v534_v29  ;;  %583 = vmatpush.msrb.mxu1 %v535_v30  ;;  %v1022_v31 = vpack.i.bf16 %v535_v30, %v534_v29 }
 0x115   : > { %987 = vmatmul.msk.f32.vlgmr.msrb.gmra.mxu0 %vm432_vm0, %v986_v32  ;;  %988 = vmatmul.msk.f32.vlgmr.msrb.gmra.mxu1 %vm432_vm0, %v986_v32 }
 0x116   : > { %666 = vmatpush.msra.mxu0 %v418_v0  ;;  %686 = vmatpush.msra.mxu1 %v419_v1  ;;  %v993_v1 = vld [vmem:[%s1244_s8 + $0x8] sm:$0xff] }
 0x117   : > { %1023 = vrot.lane.b32.xlu1 %v1022_v31, %s1047_s28 }
 0x11d   : > { %991 = vmatmul.msk.f32.vlgmr.msra.gmra.mxu0 %vm432_vm0, %v641_v35  ;;  %992 = vmatmul.msk.f32.vlgmr.msra.gmra.mxu1 %vm432_vm0, %v641_v35 }
 0x11f   : > { %634 = vperm.xlu1 %1027, %v631_v33  }
 0x127   : > { %796 = vperm.xlu1 %1027, %v793_v36  }
 0x189   : > { %v1024_v37 = vpop.permute.xlu1 %1023 }
 0x18a   : > { %v1026_v38 = vunpack.i.h.bf16 %v1024_v37  ;;  %v1025_v39 = vunpack.i.l.bf16 %v1024_v37  ;;  %v904_v37 = vpop.permute.xlu0 %903 }
 0x18c   : > { %v541_v41 = vsel %vm426_vm1, %v1026_v38, %v1025_v39  ;;  %v540_v42 = vsel %vm426_vm1, %v1025_v39, %v1026_v38 }
 0x18d   : > { %606 = vmatpush.msrb.mxu2 %v541_v41  ;;  %626 = vmatpush.msrb.mxu3 %v540_v42 }
 0x18e   : > { %989 = vmatmul.msk.f32.vlgmr.msrb.gmra.mxu2 %vm432_vm0, %v542_v40  ;;  %990 = vmatmul.msk.f32.vlgmr.msrb.gmra.mxu3 %vm432_vm0, %v542_v40 }
 0x191   : > { %v635_v52 = vpop.permute.xlu1 %634 }
 0x192   : > { %v565_v43 = vpop.f32.mrf.mxu0  ;;  %v585_v44 = vpop.f32.mrf.mxu1 }
 0x199   : > { %v797_v16 = vpop.permute.xlu1 %796 }
 0x19a   : > { %v668_v46 = vpop.f32.mrf.mxu0  ;;  %v688_v47 = vpop.f32.mrf.mxu1 }
 0x19b   : > { %v669_v55 = vadd.f32 %v668_v46, %v646_v45  ;;  %v689_v56 = vadd.f32 %v688_v47, %v646_v45 }
 0x211   : > { %v608_v48 = vpop.f32.mrf.mxu2  ;;  %v628_v49 = vpop.f32.mrf.mxu3 }
 0x212   : > { %v609_v50 = vadd.f32 %v608_v48, %v565_v43  ;;  %v629_v51 = vadd.f32 %v628_v49, %v585_v44 }
 0x214   : > { %v637_v53 = vadd.f32 %v635_v52, %v609_v50  ;;  %v638_v54 = vadd.f32 %v635_v52, %v629_v51 }
 0x216   : > { %v639_v57 = vmax.f32 %v637_v53, 0.0  ;;  %v640_v58 = vmax.f32 %v638_v54, 0.0 }
 0x218   : > { %v691_v59 = vadd.f32 %v669_v55, %v639_v57  ;;  %v692_v60 = vadd.f32 %v689_v56, %v640_v58 }
 0x21a   : > { %v693_v61 = vmax.f32 %v691_v59, 0.0  ;;  %v694_v62 = vmax.f32 %v692_v60, 0.0 }
 0x21c   : > { %v695_v63 = vmul.f32 %v693_v61, %v1158_v25  ;;  %v696_v0 = vmul.f32 %v694_v62, %v1160_v26 }
 0x21e   : > { %725 = vmatpush.msra.mxu2 %v695_v63  ;;  %745 = vmatpush.msra.mxu3 %v696_v0  ;;  %v1029_v2 = vpack.i.bf16 %v696_v0, %v695_v63 }
 0x21f   : > { %994 = vmatmul.msk.f32.vlgmr.msra.gmra.mxu2 %vm432_vm0, %v993_v1  ;;  %995 = vmatmul.msk.f32.vlgmr.msra.gmra.mxu3 %vm432_vm0, %v993_v1 }
 0x220   : > { %1030 = vrot.lane.b32.xlu2 %v1029_v2, %s1049_s20 }
 0x27a   : > { %v1031_v3 = vpop.permute.xlu2 %1030 }
 0x27b   : > { %v1033_v4 = vunpack.i.h.bf16 %v1031_v3  ;;  %v1032_v5 = vunpack.i.l.bf16 %v1031_v3 }
 0x27d   : > { %v703_v7 = vsel %vm701_vm2, %v1033_v4, %v1032_v5  ;;  %v702_v9 = vsel %vm701_vm2, %v1032_v5, %v1033_v4 }
 0x27e   : > { %768 = vmatpush.msrb.mxu0 %v703_v7  ;;  %788 = vmatpush.msrb.mxu1 %v702_v9 }
 0x27f   : > { %996 = vmatmul.msk.f32.vlgmr.msrb.gmra.mxu0 %vm432_vm0, %v704_v6  ;;  %997 = vmatmul.msk.f32.vlgmr.msrb.gmra.mxu1 %vm432_vm0, %v704_v6 }
 0x2a2   : > { %v727_v10 = vpop.f32.mrf.mxu2  ;;  %v747_v11 = vpop.f32.mrf.mxu3 }
 0x2fc   : > { %v770_v12 = vpop.f32.mrf.mxu0  ;;  %v790_v13 = vpop.f32.mrf.mxu1 }
 0x2fd   : > { %v771_v14 = vadd.f32 %v770_v12, %v727_v10  ;;  %v791_v15 = vadd.f32 %v790_v13, %v747_v11 }
 0x2ff   : > { %v799_v17 = vadd.f32 %v797_v16, %v771_v14  ;;  %v800_v18 = vadd.f32 %v797_v16, %v791_v15 }
 0x301   : > { %v801_v19 = vmax.f32 %v799_v17, 0.0  ;;  %v802_v20 = vmax.f32 %v800_v18, 0.0 }
 0x303   : > { %v803_v21 = vmul.f32 %v801_v19, %v1158_v25  ;;  %v804_v22 = vmul.f32 %v802_v20, %v1160_v26  ;;  %v811_v25 = vld [vmem:[%s1246_s10] sm:$0xff] }
 0x305   : > { %832 = vmatpush.msrb.mxu2 %v803_v21  ;;  %852 = vmatpush.msrb.mxu3 %v804_v22  ;;  %v1034_v24 = vpack.i.bf16 %v804_v22, %v803_v21 }
 0x306   : > { %999 = vmatmul.msk.f32.vlgmr.msrb.gmra.mxu2 %vm432_vm0, %v998_v23  ;;  %1000 = vmatmul.msk.f32.vlgmr.msrb.gmra.mxu3 %vm432_vm0, %v998_v23 }
 0x307   : > { %1035 = vrot.lane.b32.xlu2 %v1034_v24, %s1049_s20 }
 0x361   : > { %v1036_v27 = vpop.permute.xlu2 %1035 }
 0x362   : > { %v1038_v28 = vunpack.i.h.bf16 %v1036_v27  ;;  %v1037_v29 = vunpack.i.l.bf16 %v1036_v27 }
 0x364   : > { %v810_v26 = vsel %vm701_vm2, %v1038_v28, %v1037_v29  ;;  %v809_v30 = vsel %vm701_vm2, %v1037_v29, %v1038_v28 }
 0x365   : > { %875 = vmatpush.msra.mxu0 %v810_v26  ;;  %895 = vmatpush.msra.mxu1 %v809_v30 }
 0x366   : > { %1001 = vmatmul.msk.f32.vlgmr.msra.gmra.mxu0 %vm432_vm0, %v811_v25  ;;  %1002 = vmatmul.msk.f32.vlgmr.msra.gmra.mxu1 %vm432_vm0, %v811_v25 }
 0x389   : > { %v834_v31 = vpop.f32.mrf.mxu2  ;;  %v854_v32 = vpop.f32.mrf.mxu3 }
 0x3e3   : > { %v877_v33 = vpop.f32.mrf.mxu0  ;;  %v897_v34 = vpop.f32.mrf.mxu1 }
 0x3e4   : > { %v878_v35 = vadd.f32 %v877_v33, %v834_v31  ;;  %v898_v36 = vadd.f32 %v897_v34, %v854_v32 }
 0x3e6   : > { %v906_v38 = vadd.f32 %v904_v37, %v878_v35  ;;  %v907_v39 = vadd.f32 %v904_v37, %v898_v36 }
 0x3e8   : > { %v908_v40 = vmax.f32 %v906_v38, 0.0  ;;  %v909_v41 = vmax.f32 %v907_v39, 0.0 }
 0x3ea   : > { %v910_v8 = vadd.f32 %v908_v40, %v695_v63  ;;  %v911_v42 = vadd.f32 %v909_v41, %v696_v0 }
 0x3ec   : > { %v912_v43 = vmax.f32 %v910_v8, 0.0  ;;  %v913_v44 = vmax.f32 %v911_v42, 0.0 }
 0x3ee   : > { %914 = vst [vmem:[%s415_s14] sm:$0xff] %v912_v43 }
 0x3ef   : > { %915 = vst [vmem:[%s415_s14 + $0x8] sm:$0xff] %v913_v44 }
 0x3f0 PF: > { %s22_s21 = sadd.s32 1, %s1045_s21  }
 0x3f1   : > { %p19_p4 = scmp.ge.s32.totalorder %s22_s21, 4  }
 0x3f3   :  { %21 = sbr.rel (!%p19_p4) target bundleno = 1 (0x1), region = 102 }

</bundles_post_ra>
